<compile_context>
chip_gen: v5e
topology: v5e:2x2
jax: 0.10.0
libtpu: 0.0.40
codegen_flags: <defaults>
</compile_context>

<pallas_src>
import functools

import jax
import jax.numpy as jnp
from jax import lax
from jax.experimental import pallas as pl
from jax.experimental.pallas import tpu as pltpu


def _round_up(x, m):
    return ((x + m - 1) // m) * m


# --------------------------------------------------------------------------- #
# Pass 1: per-pixel 1x1-conv projections (feat_b, feat_c, feat_d)
# --------------------------------------------------------------------------- #
def _proj_kernel(x_ref, wb_ref, bb_ref, wc_ref, bc_ref, wd_ref, bd_ref,
                 fb_ref, fc_ref, fd_ref):
    """One (batch, row-tile) grid step of the projection pass.

    x_ref  : (tp, Cp) f32 pixels -> cast to bf16 in-register for the MXU
    w*_ref : bf16 weights (resident: constant index maps)
    b*_ref : f32 biases
    f*_ref : bf16 outputs feat_b / feat_c / feat_d
    """
    x = x_ref[...].astype(jnp.bfloat16)
    fb_ref[...] = (jnp.dot(x, wb_ref[...], preferred_element_type=jnp.float32)
                   + bb_ref[...]).astype(jnp.bfloat16)
    fc_ref[...] = (jnp.dot(x, wc_ref[...], preferred_element_type=jnp.float32)
                   + bc_ref[...]).astype(jnp.bfloat16)
    fd_ref[...] = (jnp.dot(x, wd_ref[...], preferred_element_type=jnp.float32)
                   + bd_ref[...]).astype(jnp.bfloat16)


# --------------------------------------------------------------------------- #
# Pass 2: flash-tiled attention + residual
# --------------------------------------------------------------------------- #
def _pam_flash_kernel(fb_ref, fc_ref, fd_ref, xres_ref, alpha_ref, o_ref,
                      m_scr, l_scr, acc_scr, *, hw_valid, tile_k, mask_last):
    """One (batch, query-tile, kv-tile) grid step of PAM.

    fb_ref  : (tq, C8p) bf16 query projections (resident across the kv axis)
    fc_ref  : (tk, C8p) bf16 key projections
    fd_ref  : (tk, Cp)  bf16 value projections
    xres_ref: (tq, Cp)  f32 residual input
    alpha   : (1,) f32 scalar in SMEM
    scratch : m/l (tq, 1), acc (tq, Cp) -- all f32
    """
    ki = pl.program_id(2)
    nk = pl.num_programs(2)

    @pl.when(ki == 0)
    def _init():
        m_scr[...] = jnp.full_like(m_scr, -jnp.inf)
        l_scr[...] = jnp.zeros_like(l_scr)
        acc_scr[...] = jnp.zeros_like(acc_scr)

    def _update(masked):
        # logits = feat_b @ feat_c^T; contract the last dims of both operands so
        # no explicit feat_c transpose (no XLU copy); bf16 operands, f32 accum.
        logits = lax.dot_general(
            fb_ref[...], fc_ref[...],
            dimension_numbers=(((1,), (1,)), ((), ())),
            preferred_element_type=jnp.float32)                     # (tq, tk)
        if masked:
            col = lax.broadcasted_iota(jnp.int32, logits.shape, 1) + ki * tile_k
            logits = jnp.where(col < hw_valid, logits, -jnp.inf)

        # Online softmax, f32 statistics.  (exp could run in bf16 on v6e/v7x
        # once MXU-bound; kept f32 for accuracy and v5e compatibility.)
        m_prev = m_scr[...]
        m_new = jnp.maximum(m_prev, jnp.max(logits, axis=-1, keepdims=True))
        corr = jnp.exp(m_prev - m_new)
        p = jnp.exp(logits - m_new)                                 # (tq, tk)
        l_scr[...] = corr * l_scr[...] + jnp.sum(p, axis=-1, keepdims=True)
        acc_scr[...] = corr * acc_scr[...] + jnp.dot(
            p.astype(jnp.bfloat16), fd_ref[...],
            preferred_element_type=jnp.float32)                     # (tq, Cp)
        m_scr[...] = m_new

    if not mask_last:
        _update(False)
    else:
        # Padded kv columns exist only in the last kv tile (padding < tile_k by
        # construction, so that tile always has >=1 valid column and the online
        # softmax never sees an all -inf row).
        @pl.when(ki < nk - 1)
        def _unmasked():
            _update(False)

        @pl.when(ki == nk - 1)
        def _masked():
            _update(True)

    @pl.when(ki == nk - 1)
    def _fin():
        inv_l = pl.reciprocal(l_scr[...], approx=True)
        o_ref[...] = (alpha_ref[0] * (acc_scr[...] * inv_l)
                      + xres_ref[...]).astype(o_ref.dtype)


# --------------------------------------------------------------------------- #
# Tile selection & wrapper
# --------------------------------------------------------------------------- #
def _flash_vmem_bytes(t, Cp, C8p):
    return (2 * t * C8p * 2            # fb (bf16, double-buffered)
            + 2 * t * C8p * 2          # fc
            + 2 * t * Cp * 2           # fd
            + 2 * t * Cp * 4           # residual x (f32)
            + 2 * t * Cp * 4           # output (f32)
            + t * Cp * 4 + 2 * t * 4   # acc / m / l scratch
            + 3 * t * t * 4)           # logits / p temporaries


def _choose_tile(hw, Cp, C8p, budget_bytes=28 << 20):
    """Largest tile in {512, 256, 128} with <=25% extra spatial padding (vs the
    minimal 128-granular padding) that fits the VMEM budget."""
    base = _round_up(hw, 128)
    tile = 128
    for cand in (256, 512):
        if (_round_up(hw, cand) * 4 <= base * 5
                and _flash_vmem_bytes(cand, Cp, C8p) <= budget_bytes):
            tile = cand
    return tile


def position_attention_module(x_nchw, wb, bb, wc, bc, wd, bd, alpha):
    """x_nchw: (B, C, H, W) f32.  Weights in channels-last matmul form:
       wb/wc: (C, C//8), wd: (C, C), biases: (Cout,), alpha: (1,) scalar."""
    B, C, H, W = x_nchw.shape
    C8 = wb.shape[1]
    HW = H * W

    Cp = _round_up(C, 128)
    C8p = _round_up(C8, 128)
    tile = _choose_tile(HW, Cp, C8p)
    HWp = _round_up(HW, tile)
    n_t = HWp // tile

    # NCHW -> (B, HWp, Cp), transpose + pad in one XLA pass; kept f32 (residual
    # path), projections cast to bf16 in-register inside the kernel.
    # TODO(synk): if the surrounding model can stay channels-last, both
    # transposes (and this copy) disappear entirely.
    x = jnp.transpose(x_nchw, (0, 2, 3, 1)).reshape(B, HW, C).astype(jnp.float32)
    x = jnp.pad(x, ((0, 0), (0, HWp - HW), (0, Cp - C)))

    wb_p = jnp.pad(wb, ((0, Cp - C), (0, C8p - C8))).astype(jnp.bfloat16)
    wc_p = jnp.pad(wc, ((0, Cp - C), (0, C8p - C8))).astype(jnp.bfloat16)
    wd_p = jnp.pad(wd, ((0, Cp - C), (0, Cp - C))).astype(jnp.bfloat16)
    bb_p = jnp.pad(bb, (0, C8p - C8)).astype(jnp.float32).reshape(1, C8p)
    bc_p = jnp.pad(bc, (0, C8p - C8)).astype(jnp.float32).reshape(1, C8p)
    bd_p = jnp.pad(bd, (0, Cp - C)).astype(jnp.float32).reshape(1, Cp)
    alpha1 = alpha.reshape(1).astype(jnp.float32)

    # ---- pass 1: projections (feat_b, feat_c, feat_d once per pixel) -------
    proj_vmem = (2 * tile * Cp * 4                       # x tiles (f32, 2-buf)
                 + 2 * (2 * Cp * C8p + Cp * Cp) * 2      # weights (bf16, 2-buf)
                 + (2 * C8p + Cp) * 4 * 2                # biases (f32)
                 + 2 * (2 * tile * C8p + tile * Cp) * 2  # outputs (bf16, 2-buf)
                 + 3 * tile * Cp * 4)                    # temporaries
    proj_limit = int(min(max(2 * proj_vmem, 16 << 20), 40 << 20))

    fb, fc, fd = pl.pallas_call(
        _proj_kernel,
        out_shape=(jax.ShapeDtypeStruct((B, HWp, C8p), jnp.bfloat16),
                   jax.ShapeDtypeStruct((B, HWp, C8p), jnp.bfloat16),
                   jax.ShapeDtypeStruct((B, HWp, Cp), jnp.bfloat16)),
        grid_spec=pltpu.PrefetchScalarGridSpec(
            num_scalar_prefetch=0,
            grid=(B, n_t),
            in_specs=[
                pl.BlockSpec((None, tile, Cp), lambda b, i: (b, i, 0)),   # x
                pl.BlockSpec((Cp, C8p), lambda b, i: (0, 0)),             # wb
                pl.BlockSpec((1, C8p), lambda b, i: (0, 0)),              # bb
                pl.BlockSpec((Cp, C8p), lambda b, i: (0, 0)),             # wc
                pl.BlockSpec((1, C8p), lambda b, i: (0, 0)),              # bc
                pl.BlockSpec((Cp, Cp), lambda b, i: (0, 0)),              # wd
                pl.BlockSpec((1, Cp), lambda b, i: (0, 0)),               # bd
            ],
            out_specs=[
                pl.BlockSpec((None, tile, C8p), lambda b, i: (b, i, 0)),  # fb
                pl.BlockSpec((None, tile, C8p), lambda b, i: (b, i, 0)),  # fc
                pl.BlockSpec((None, tile, Cp), lambda b, i: (b, i, 0)),   # fd
            ],
        ),
        compiler_params=pltpu.CompilerParams(
            dimension_semantics=("parallel", "parallel"),
            vmem_limit_bytes=proj_limit),
    )(x, wb_p, bb_p, wc_p, bc_p, wd_p, bd_p)

    # ---- pass 2: flash-tiled attention + residual ---------------------------
    kernel = functools.partial(_pam_flash_kernel, hw_valid=HW, tile_k=tile,
                               mask_last=(HWp != HW))
    flash_limit = int(min(max(2 * _flash_vmem_bytes(tile, Cp, C8p), 16 << 20),
                          40 << 20))

    out = pl.pallas_call(
        kernel,
        out_shape=jax.ShapeDtypeStruct((B, HWp, Cp), jnp.float32),
        grid_spec=pltpu.PrefetchScalarGridSpec(
            num_scalar_prefetch=0,
            grid=(B, n_t, n_t),
            in_specs=[
                pl.BlockSpec((None, tile, C8p), lambda b, qi, ki: (b, qi, 0)),  # fb
                pl.BlockSpec((None, tile, C8p), lambda b, qi, ki: (b, ki, 0)),  # fc
                pl.BlockSpec((None, tile, Cp), lambda b, qi, ki: (b, ki, 0)),   # fd
                pl.BlockSpec((None, tile, Cp), lambda b, qi, ki: (b, qi, 0)),   # x (residual)
                pl.BlockSpec(memory_space=pltpu.MemorySpace.SMEM),              # alpha
            ],
            out_specs=pl.BlockSpec((None, tile, Cp), lambda b, qi, ki: (b, qi, 0)),
            scratch_shapes=[
                pltpu.VMEM((tile, 1), jnp.float32),    # running max
                pltpu.VMEM((tile, 1), jnp.float32),    # running sum
                pltpu.VMEM((tile, Cp), jnp.float32),   # output accumulator
            ],
        ),
        compiler_params=pltpu.CompilerParams(
            dimension_semantics=("parallel", "parallel", "arbitrary"),
            vmem_limit_bytes=flash_limit),
    )(fb, fc, fd, x, alpha1)

    out = out[:, :HW, :C]                                  # drop padding (fused)
    return jnp.transpose(out.reshape(B, H, W, C), (0, 3, 1, 2))


# --------------------------------------------------------------------------- #
# Reference & tests
# --------------------------------------------------------------------------- #
def _reference(x_nchw, wb, bb, wc, bc, wd, bd, alpha):
    # Pure-JAX f32 reference mirroring the PyTorch forward (NCHW semantics).
    B, C, H, W = x_nchw.shape
    HW = H * W
    x = jnp.transpose(x_nchw, (0, 2, 3, 1)).reshape(B, HW, C)
    feat_b = x @ wb + bb
    feat_c = x @ wc + bc
    logits = jnp.einsum("bic,bjc->bij", feat_b, feat_c)
    att = jax.nn.softmax(logits, axis=-1)
    feat_d = x @ wd + bd
    feat_e = jnp.einsum("bij,bjc->bic", att, feat_d)
    out = alpha[0] * feat_e + x
    return jnp.transpose(out.reshape(B, H, W, C), (0, 3, 1, 2))


def _run_case(key, B, C, H, W):
    C8 = max(C // 8, 1)
    kx, kwb, kbb, kwc, kbc, kwd, kbd = jax.random.split(key, 7)
    x = jax.random.normal(kx, (B, C, H, W), dtype=jnp.float32)
    # conv weights stored in channels-last matmul form (C_in, C_out)
    # (PyTorch conv weight (Cout, Cin, 1, 1) -> w[Cin, Cout]).
    wb = jax.random.normal(kwb, (C, C8), dtype=jnp.float32) * 0.1
    bb = jax.random.normal(kbb, (C8,), dtype=jnp.float32) * 0.1
    wc = jax.random.normal(kwc, (C, C8), dtype=jnp.float32) * 0.1
    bc = jax.random.normal(kbc, (C8,), dtype=jnp.float32) * 0.1
    wd = jax.random.normal(kwd, (C, C), dtype=jnp.float32) * 0.1
    bd = jax.random.normal(kbd, (C,), dtype=jnp.float32) * 0.1
    # nn.Parameter(torch.zeros(1)) -> 0.5 here so the attention path is exercised.
    alpha = jnp.array([0.5], dtype=jnp.float32)

    out = position_attention_module(x, wb, bb, wc, bc, wd, bd, alpha)
    out = jax.block_until_ready(out)
    ref = _reference(x, wb, bb, wc, bc, wd, bd, alpha)
    assert out.shape == (B, C, H, W)
    # bf16 MXU operands in the projection + attention matmuls -> loosened
    # tolerance vs the f32 reference.
    assert jnp.allclose(out, ref, atol=1e-2, rtol=1e-2), (
        float(jnp.max(jnp.abs(out - ref))))


if __name__ == "__main__":
    key = jax.random.PRNGKey(0)
    k1, k2, k3 = jax.random.split(key, 3)
    # single-tile, exact fit (HW=256 -> tile 256): no kv mask, two batches
    _run_case(k1, B=2, C=16, H=16, W=16)
    # multi-tile (HW=576 -> padded to 768, 3x3 tiles of 256): exercises the
    # online-softmax accumulation across kv steps + last-tile masking
    _run_case(k2, B=1, C=8, H=24, W=24)
    # tiny single-tile with padding (HW=64 -> 128): masked single kv step
    _run_case(k3, B=2, C=8, H=8, W=8)
    print("KERNEL_OK")
</pallas_src>

<mosaic_0001>
module attributes {stable_mosaic.version = 11 : i64} {
  func.func @_proj_kernel(%arg0: i32, %arg1: i32, %arg2: memref<1x256x128xf32, #tpu.memory_space<vmem>>, %arg3: memref<128x128xbf16, #tpu.memory_space<vmem>>, %arg4: memref<1x128xf32, #tpu.memory_space<vmem>>, %arg5: memref<128x128xbf16, #tpu.memory_space<vmem>>, %arg6: memref<1x128xf32, #tpu.memory_space<vmem>>, %arg7: memref<128x128xbf16, #tpu.memory_space<vmem>>, %arg8: memref<1x128xf32, #tpu.memory_space<vmem>>, %arg9: memref<1x256x128xbf16, #tpu.memory_space<vmem>>, %arg10: memref<1x256x128xbf16, #tpu.memory_space<vmem>>, %arg11: memref<1x256x128xbf16, #tpu.memory_space<vmem>>) attributes {dimension_semantics = [#tpu.dimension_semantics<parallel>, #tpu.dimension_semantics<parallel>], iteration_bounds = array<i64: 2, 1>, scalar_prefetch = 0 : i64, scratch_operands = 0 : i64, tpu.core_type = #tpu.core_type<tc>, window_params = [{transform_indices = @transform_0, window_bounds = array<i64: 1, 256, 128>}, {pipeline_mode = #tpu.pipeline_mode<synchronous>, transform_indices = @transform_1, window_bounds = array<i64: 128, 128>}, {pipeline_mode = #tpu.pipeline_mode<synchronous>, transform_indices = @transform_2, window_bounds = array<i64: 1, 128>}, {pipeline_mode = #tpu.pipeline_mode<synchronous>, transform_indices = @transform_3, window_bounds = array<i64: 128, 128>}, {pipeline_mode = #tpu.pipeline_mode<synchronous>, transform_indices = @transform_4, window_bounds = array<i64: 1, 128>}, {pipeline_mode = #tpu.pipeline_mode<synchronous>, transform_indices = @transform_5, window_bounds = array<i64: 128, 128>}, {pipeline_mode = #tpu.pipeline_mode<synchronous>, transform_indices = @transform_6, window_bounds = array<i64: 1, 128>}, {transform_indices = @transform_7, window_bounds = array<i64: 1, 256, 128>}, {transform_indices = @transform_8, window_bounds = array<i64: 1, 256, 128>}, {transform_indices = @transform_9, window_bounds = array<i64: 1, 256, 128>}]} {
    %c0 = arith.constant 0 : index
    %c0_0 = arith.constant 0 : index
    %c0_1 = arith.constant 0 : index
    %0 = vector.load %arg2[%c0, %c0_0, %c0_1] : memref<1x256x128xf32, #tpu.memory_space<vmem>>, vector<1x256x128xf32>
    %1 = vector.shape_cast %0 : vector<1x256x128xf32> to vector<256x128xf32>
    %2 = arith.truncf %1 : vector<256x128xf32> to vector<256x128xbf16>
    %c0_2 = arith.constant 0 : index
    %c0_3 = arith.constant 0 : index
    %3 = vector.load %arg3[%c0_2, %c0_3] : memref<128x128xbf16, #tpu.memory_space<vmem>>, vector<128x128xbf16>
    %cst = arith.constant dense<0.000000e+00> : vector<256x128xf32>
    %4 = tpu.matmul %2, %3, %cst {dimension_numbers = #tpu.dot_dimension_numbers<[1], [0], [0], [1], [0, 0, 1, 1], [], []>} : vector<256x128xbf16>, vector<128x128xbf16>, vector<256x128xf32> -> vector<256x128xf32>
    %c0_4 = arith.constant 0 : index
    %c0_5 = arith.constant 0 : index
    %5 = vector.load %arg4[%c0_4, %c0_5] : memref<1x128xf32, #tpu.memory_space<vmem>>, vector<1x128xf32>
    %6 = vector.broadcast %5 : vector<1x128xf32> to vector<256x128xf32>
    %7 = arith.addf %4, %6 : vector<256x128xf32>
    %8 = arith.truncf %7 : vector<256x128xf32> to vector<256x128xbf16>
    %c0_6 = arith.constant 0 : index
    %c0_7 = arith.constant 0 : index
    %c0_8 = arith.constant 0 : index
    %9 = vector.load %arg9[%c0_6, %c0_7, %c0_8] : memref<1x256x128xbf16, #tpu.memory_space<vmem>>, vector<1x256x128xbf16>
    %10 = vector.shape_cast %9 : vector<1x256x128xbf16> to vector<256x128xbf16>
    %11 = vector.shape_cast %8 : vector<256x128xbf16> to vector<1x256x128xbf16>
    tpu.vector_store %arg9[%c0_6, %c0_7, %c0_8], %11 {strides = array<i32>} : memref<1x256x128xbf16, #tpu.memory_space<vmem>>, vector<1x256x128xbf16>,
    %c0_9 = arith.constant 0 : index
    %c0_10 = arith.constant 0 : index
    %12 = vector.load %arg5[%c0_9, %c0_10] : memref<128x128xbf16, #tpu.memory_space<vmem>>, vector<128x128xbf16>
    %cst_11 = arith.constant dense<0.000000e+00> : vector<256x128xf32>
    %13 = tpu.matmul %2, %12, %cst_11 {dimension_numbers = #tpu.dot_dimension_numbers<[1], [0], [0], [1], [0, 0, 1, 1], [], []>} : vector<256x128xbf16>, vector<128x128xbf16>, vector<256x128xf32> -> vector<256x128xf32>
    %c0_12 = arith.constant 0 : index
    %c0_13 = arith.constant 0 : index
    %14 = vector.load %arg6[%c0_12, %c0_13] : memref<1x128xf32, #tpu.memory_space<vmem>>, vector<1x128xf32>
    %15 = vector.broadcast %14 : vector<1x128xf32> to vector<256x128xf32>
    %16 = arith.addf %13, %15 : vector<256x128xf32>
    %17 = arith.truncf %16 : vector<256x128xf32> to vector<256x128xbf16>
    %c0_14 = arith.constant 0 : index
    %c0_15 = arith.constant 0 : index
    %c0_16 = arith.constant 0 : index
    %18 = vector.load %arg10[%c0_14, %c0_15, %c0_16] : memref<1x256x128xbf16, #tpu.memory_space<vmem>>, vector<1x256x128xbf16>
    %19 = vector.shape_cast %18 : vector<1x256x128xbf16> to vector<256x128xbf16>
    %20 = vector.shape_cast %17 : vector<256x128xbf16> to vector<1x256x128xbf16>
    tpu.vector_store %arg10[%c0_14, %c0_15, %c0_16], %20 {strides = array<i32>} : memref<1x256x128xbf16, #tpu.memory_space<vmem>>, vector<1x256x128xbf16>,
    %c0_17 = arith.constant 0 : index
    %c0_18 = arith.constant 0 : index
    %21 = vector.load %arg7[%c0_17, %c0_18] : memref<128x128xbf16, #tpu.memory_space<vmem>>, vector<128x128xbf16>
    %cst_19 = arith.constant dense<0.000000e+00> : vector<256x128xf32>
    %22 = tpu.matmul %2, %21, %cst_19 {dimension_numbers = #tpu.dot_dimension_numbers<[1], [0], [0], [1], [0, 0, 1, 1], [], []>} : vector<256x128xbf16>, vector<128x128xbf16>, vector<256x128xf32> -> vector<256x128xf32>
    %c0_20 = arith.constant 0 : index
    %c0_21 = arith.constant 0 : index
    %23 = vector.load %arg8[%c0_20, %c0_21] : memref<1x128xf32, #tpu.memory_space<vmem>>, vector<1x128xf32>
    %24 = vector.broadcast %23 : vector<1x128xf32> to vector<256x128xf32>
    %25 = arith.addf %22, %24 : vector<256x128xf32>
    %26 = arith.truncf %25 : vector<256x128xf32> to vector<256x128xbf16>
    %c0_22 = arith.constant 0 : index
    %c0_23 = arith.constant 0 : index
    %c0_24 = arith.constant 0 : index
    %27 = vector.load %arg11[%c0_22, %c0_23, %c0_24] : memref<1x256x128xbf16, #tpu.memory_space<vmem>>, vector<1x256x128xbf16>
    %28 = vector.shape_cast %27 : vector<1x256x128xbf16> to vector<256x128xbf16>
    %29 = vector.shape_cast %26 : vector<256x128xbf16> to vector<1x256x128xbf16>
    tpu.vector_store %arg11[%c0_22, %c0_23, %c0_24], %29 {strides = array<i32>} : memref<1x256x128xbf16, #tpu.memory_space<vmem>>, vector<1x256x128xbf16>,
    return
  }
  func.func @transform_0(%arg0: i32, %arg1: i32) -> (i32, i32, i32) {
    %c0_i32 = arith.constant 0 : i32
    %c0_i32_0 = arith.constant 0 : i32
    return %arg0, %arg1, %c0_i32 : i32, i32, i32
  }
  func.func @transform_1(%arg0: i32, %arg1: i32) -> (i32, i32) {
    %c0_i32 = arith.constant 0 : i32
    %c0_i32_0 = arith.constant 0 : i32
    %c0_i32_1 = arith.constant 0 : i32
    return %c0_i32, %c0_i32_0 : i32, i32
  }
  func.func @transform_2(%arg0: i32, %arg1: i32) -> (i32, i32) {
    %c0_i32 = arith.constant 0 : i32
    %c0_i32_0 = arith.constant 0 : i32
    %c0_i32_1 = arith.constant 0 : i32
    return %c0_i32, %c0_i32_0 : i32, i32
  }
  func.func @transform_3(%arg0: i32, %arg1: i32) -> (i32, i32) {
    %c0_i32 = arith.constant 0 : i32
    %c0_i32_0 = arith.constant 0 : i32
    %c0_i32_1 = arith.constant 0 : i32
    return %c0_i32, %c0_i32_0 : i32, i32
  }
  func.func @transform_4(%arg0: i32, %arg1: i32) -> (i32, i32) {
    %c0_i32 = arith.constant 0 : i32
    %c0_i32_0 = arith.constant 0 : i32
    %c0_i32_1 = arith.constant 0 : i32
    return %c0_i32, %c0_i32_0 : i32, i32
  }
  func.func @transform_5(%arg0: i32, %arg1: i32) -> (i32, i32) {
    %c0_i32 = arith.constant 0 : i32
    %c0_i32_0 = arith.constant 0 : i32
    %c0_i32_1 = arith.constant 0 : i32
    return %c0_i32, %c0_i32_0 : i32, i32
  }
  func.func @transform_6(%arg0: i32, %arg1: i32) -> (i32, i32) {
    %c0_i32 = arith.constant 0 : i32
    %c0_i32_0 = arith.constant 0 : i32
    %c0_i32_1 = arith.constant 0 : i32
    return %c0_i32, %c0_i32_0 : i32, i32
  }
  func.func @transform_7(%arg0: i32, %arg1: i32) -> (i32, i32, i32) {
    %c0_i32 = arith.constant 0 : i32
    %c0_i32_0 = arith.constant 0 : i32
    return %arg0, %arg1, %c0_i32 : i32, i32, i32
  }
  func.func @transform_8(%arg0: i32, %arg1: i32) -> (i32, i32, i32) {
    %c0_i32 = arith.constant 0 : i32
    %c0_i32_0 = arith.constant 0 : i32
    return %arg0, %arg1, %c0_i32 : i32, i32, i32
  }
  func.func @transform_9(%arg0: i32, %arg1: i32) -> (i32, i32, i32) {
    %c0_i32 = arith.constant 0 : i32
    %c0_i32_0 = arith.constant 0 : i32
    return %arg0, %arg1, %c0_i32 : i32, i32, i32
  }
}

</mosaic_0001>

<bundles_post_ra>
// kernel: tpu_custom_call.1
= control target key start
LH: loop header
LB: loop body
LE: loop exit
PB: predicated region body
PF: predicated region fallthrough
CT: control target
= control target key end

     0   :  { %s2799_s0 = inlined_call_operand.hbm [shape: f32[2,256,128], index: 0, kind: input, shape index: {}]   ;;  %s2800_s1 = inlined_call_operand.hbm [shape: bf16[128,128], index: 1, kind: input, shape index: {}]   ;;  %s2801_s2 = inlined_call_operand.vmem [shape: f32[1,128], index: 2, kind: input, shape index: {}]   ;;  %s2802_s3 = inlined_call_operand.hbm [shape: bf16[128,128], index: 3, kind: input, shape index: {}]   ;;  %s2803_s4 = inlined_call_operand.vmem [shape: f32[1,128], index: 4, kind: input, shape index: {}]   ;;  %s2804_s5 = inlined_call_operand.hbm [shape: bf16[128,128], index: 5, kind: input, shape index: {}]   ;;  %s2805_s6 = inlined_call_operand.vmem [shape: f32[1,128], index: 6, kind: input, shape index: {}]   ;;  %s2806_s7 = inlined_call_operand.hbm [shape: bf16[2,256,128], index: 7, kind: output, shape index: {0}]   ;;  %s2807_s8 = inlined_call_operand.hbm [shape: bf16[2,256,128], index: 8, kind: output, shape index: {1}]   ;;  %s2808_s9 = inlined_call_operand.hbm [shape: bf16[2,256,128], index: 9, kind: output, shape index: {2}]  }
   0x1   :  { %2815 = sst [smem:[#allocation23_spill]] %s2800_s1 }
   0x2   :  { %2816 = sst [smem:[#allocation24_spill]] %s2802_s3 }
   0x3   :  { %2817 = sst [smem:[#allocation25_spill]] %s2804_s5 }
   0x4   :  { %15 = vsyncpa [#allocation3], 0 }
   0x5   :  { %17 = vsyncpa [#allocation3 + $0x1], 0 }
   0x6   :  { %18 = vsyncpa [#allocation6], 0 }
   0x7   :  { %19 = vsyncpa [#allocation9], 0 }
   0x8   :  { %20 = vsyncpa [#allocation4], 0 }
   0x9   :  { %22 = vsyncpa [#allocation4 + $0x1], 0 }
   0xa   :  { %23 = vsyncpa [#allocation12], 0 }
   0xb   :  { %25 = vsyncpa [#allocation12 + $0x1], 0  ;;  %s2314_s30 = smov 0   ;;  %s2316_s10 = smov 0  }
   0xc   :  { %s2318_s11 = smov 0   ;;  %s2320_s12 = smov 0  }
   0xd   :  { %s2322_s13 = smov 0   ;;  %s2324_s14 = smov 0  }
   0xe LB: > { %2818 = sst [smem:[#allocation19_spill]] %s2233_s30  ;;  %s2345_s15 = sadd.s32 4294967295, %s2253_s14   ;;  %s2253_s14 = sphi %s2324_s14, %s31_s14   ;;  %s2249_s13 = sphi %s2322_s13, %s2840_s13   ;;  %s2245_s12 = sphi %s2320_s12, %s2839_s12   ;;  %s2241_s11 = sphi %s2318_s11, %s2838_s11   ;;  %s2237_s10 = sphi %s2316_s10, %s2837_s10   ;;  %s2233_s30 = sphi %s2314_s30, %s2836_s30  }
   0xf   : > { %2819 = sst [smem:[#allocation20_spill]] %s2253_s14  ;;  %s2809_s16 = sadd.s32 4294967294, %s2253_s14  }
  0x10   : > { %p65_p0 = scmp.ne.s32.totalorder %s2237_s10, %s2233_s30  ;;  %p66_p1 = scmp.eq.s32.totalorder %s2345_s15, 0 }
  0x11   : > { %p217_p2 = scmp.eq.s32.totalorder %s2345_s15, 1  ;;  %p223_p3 = scmp.eq.s32.totalorder %s2809_s16, 1 }
  0x12   : > { %p2356_p4 = por %p66_p1, %p65_p0  ;;  %p1411_p5 = scmp.ge.s32.totalorder %s2253_s14, 1 }
  0x13   : > { %p2361_p6 = por %p223_p3, %p65_p0  ;;  %p286_p7 = scmp.lt.s32.totalorder %s2253_s14, 3 }
  0x14   : > { %s2823_s1 = sld [smem:[#allocation23_spill]]  ;;  %s2255_s23 = smov [#allocation5]  }
  0x15   : > { %s2821_s18 = scalar_select %p2361_p6, 1, 0 }
  0x16   : > { %p2369_p8 = pnand %p1411_p5, %p286_p7  ;;  %s299_s24 = sshll.u32 %s2255_s23, 4  ;;  %s300_s24 = int_to_ptr.vmem [resolvable:$true] %s299_s24 }
  0x17   : > { %2822 = sst [smem:[#allocation21_spill]] %s2821_s18  ;;  %p1415_p11 = scmp.ge.s32.totalorder %s2253_s14, 2 }
  0x18   : > { %p1891_p9 = pneg %p2369_p8  ;;  %s2826_s3 = sld [smem:[#allocation24_spill]] }
  0x19   : > { %s2256_s29 = smov 64   ;;  %s2257_s19 = smov 4  }
  0x1a   : > { %s297_s21 = sshll.u32 %s2823_s1, 4  ;;  %p2377_p10 = pnand %p1891_p9, %p66_p1  ;;  %s298_s21 = int_to_ptr.hbm [resolvable:$true] %s297_s21 }
  0x1b   : > { %s2258_s20 = smov [#allocation7]   ;;  %s2827_s5 = sld [smem:[#allocation25_spill]] }
  0x1c   : > { %1894 = dma.hbm_to_vmem [thread:$0]  (!%p2377_p10), %s298_s21, 1024, %s300_s24, [#allocation6], %s2256_s29, %s2256_s29, %s2257_s19  }
  0x1d   : > { %s316_s23 = sshll.u32 %s2258_s20, 4  ;;  %s2259_s26 = smov [#allocation8]   ;;  %s317_s23 = int_to_ptr.vmem [resolvable:$true] %s316_s23 }
  0x1e   : > { %s314_s28 = sshll.u32 %s2826_s3, 4  ;;  %s333_s27 = sshll.u32 %s2259_s26, 4  ;;  %s315_s28 = int_to_ptr.hbm [resolvable:$true] %s314_s28  ;;  %s334_s27 = int_to_ptr.vmem [resolvable:$true] %s333_s27 }
  0x1f   : > { %1897 = dma.hbm_to_vmem [thread:$0]  (!%p2377_p10), %s315_s28, 1024, %s317_s23, [#allocation6], %s2256_s29, %s2256_s29, %s2257_s19  }
  0x20   : > { %s43_s21 = sadd.s32 1, %s2249_s13  ;;  %s52_s24 = sadd.s32 1, %s2241_s11 }
  0x21   : > { %s331_s18 = sshll.u32 %s2827_s5, 4  ;;  %p45_p12 = scmp.ge.s32.totalorder %s43_s21, 2  ;;  %s332_s18 = int_to_ptr.hbm [resolvable:$true] %s331_s18 }
  0x22   : > { %1900 = dma.hbm_to_vmem [thread:$0]  (!%p2377_p10), %s332_s18, 1024, %s334_s27, [#allocation9], %s2256_s29, %s2256_s29, %s2257_s19  }
  0x23   : > { %p59_p13 = scmp.ne.s32.totalorder %s2241_s11, %s2237_s10  ;;  %p60_p0 = scmp.eq.s32.totalorder %s2253_s14, 0 }
  0x24   : > { %s2842_s21 = smov (%p45_p12, %s43_s21), 0  ;;  %p1918_p7 = scmp.lt.s32.totalorder %s2253_s14, 2 }
  0x25   : > { %2828 = sst [smem:[#allocation22_spill]] %s2842_s21  ;;  %p2401_p3 = por %p60_p0, %p59_p13 }
  0x26   : > { %p2407_p5 = por %p217_p2, %p59_p13  ;;  %s47_s25 = ssub.s32 %s2249_s13, %s2842_s21 }
  0x27   : > { %p50_p9 = scmp.eq.s32.totalorder %s47_s25, 0  ;;  %s350_s18 = sand.u32 1, %s2241_s11  }
  0x28   : > { %s1416_s28 = sshll.u32 %s350_s18, 8  ;;  %s1534_s19 = sshll.u32 %s2249_s13, 8 }
  0x29   : > { %s2416_s29 = scalar_select %p50_p9, %s2241_s11, %s52_s24  }
  0x2a   : > { %s361_s26 = scalar_lea.hbm %s2799_s0, %s1534_s19  ;;  %s354_s27 = scalar_lea.vmem [#allocation2], %s1416_s28 }
  0x2b   : > { %s364_s3 = sshll.u32 %s354_s27, 4  ;;  %s362_s5 = sshll.u32 %s361_s26, 4  ;;  %s365_s3 = int_to_ptr.vmem [resolvable:$true] %s364_s3  ;;  %s363_s5 = int_to_ptr.hbm [resolvable:$true] %s362_s5 }
  0x2c   : > { %p1902_p2 = pnand %p1918_p7, %p2401_p3  ;;  %s351_s30 = scalar_lea.sflag [#allocation3], %s350_s18 }
  0x2d   : > { %s2260_s21 = smov 128   ;;  %s2261_s14 = smov 8  }
  0x2e   : > { %1904 = dma.hbm_to_vmem [thread:$0]  (!%p1902_p2), %s363_s5, 4096, %s365_s3, %s351_s30, %s2260_s21, %s2260_s21, %s2261_s14  }
  0x2f   : > { %376 = sbr.rel (%p2369_p8) target bundleno = 434 (0x1b2), region = 48  ;;  %s2427_s24 = sand.u32 (!%p2369_p8), 1, %s2237_s10  }
  0x30   : > { %s1420_s25 = sshll.u32 (!%p2369_p8), %s2427_s24, 8  ;;  %s379_s28 = scalar_lea.sflag (!%p2369_p8), [#allocation3], %s2427_s24 }
  0x31   : > { %s2431_s19 = scalar_lea.vmem (!%p2369_p8), [#allocation2], %s1420_s25 }
  0x34   : > { %2212 = dma.done.wait (%p2356_p4), %s379_s28, 4096  }
  0x35   : > { %2214 = vsyncadd (%p2356_p4), %s379_s28, 4294963200 }
  0x36   : > { %2216 = dma.done.wait (%p66_p1), [#allocation6], 2048  }
  0x37   : > { %2218 = vsyncadd (%p66_p1), [#allocation6], 4294965248 }
  0x38   : > { %2220 = dma.done.wait (%p66_p1), [#allocation9], 1024  }
  0x39   : > { %2222 = vsyncadd (%p66_p1), [#allocation9], 4294966272  ;;  %v1542_v0 = vld [vmem:[#allocation5 + $0x38] sm:$0xff]  ;;  %v1541_v3 = vld [vmem:[#allocation5 + $0x30] sm:$0xff]  ;;  %s1424_s17 = sshll.u32 %s2427_s24, 7  ;;  %s1559_s23 = sshll.u32 %s2245_s12, 7 }
  0x3a   : > { %v1550_v1 = vld [vmem:[#allocation7 + $0x38] sm:$0xff]  ;;  %563 = vmatpush.bf16.msra.mxu0 %v1542_v0  ;;  %1847 = vmatpush.bf16.msra.mxu3 %v1542_v0  ;;  %v1549_v4 = vld [vmem:[#allocation7 + $0x30] sm:$0xff]  ;;  %v1540_v6 = vld [vmem:[#allocation5 + $0x28] sm:$0xff]  ;;  %s2538_s1 = scalar_lea.vmem [#allocation10], %s1424_s17  ;;  %s2541_s18 = scalar_lea.vmem [#allocation11], %s1424_s17 }
  0x3b   : > { %v2445_v2 = vld [vmem:[#allocation8 + $0x38] sm:$0xff]  ;;  %784 = vmatpush.bf16.msra.mxu1 %v1550_v1  ;;  %v2448_v5 = vld [vmem:[#allocation8 + $0x30] sm:$0xff]  ;;  %v1548_v7 = vld [vmem:[#allocation7 + $0x28] sm:$0xff]  ;;  %s2550_s20 = scalar_lea.vmem [#allocation13], %s1424_s17  ;;  %s1163_s26 = sand.u32 1, %s2345_s15  }
  0x3c   : > { %1005 = vmatpush.bf16.msra.mxu2 %v2445_v2  ;;  %v2451_v8 = vld [vmem:[#allocation8 + $0x28] sm:$0xff]  ;;  %v1539_v9 = vld [vmem:[#allocation5 + $0x20] sm:$0xff]  ;;  %v1538_v12 = vld [vmem:[#allocation5 + $0x18] sm:$0xff]  ;;  %s1201_s28 = scalar_lea.hbm %s2807_s8, %s1559_s23  ;;  %s1182_s30 = scalar_lea.hbm %s2806_s7, %s1559_s23 }
  0x3d   : > { %v1547_v10 = vld [vmem:[#allocation7 + $0x20] sm:$0xff]  ;;  %v1546_v13 = vld [vmem:[#allocation7 + $0x18] sm:$0xff]  ;;  %v1537_v15 = vld [vmem:[#allocation5 + $0x10] sm:$0xff]  ;;  %s2690_s12 = sshll.u32 %s1201_s28, 4  ;;  %s1183_s15 = sshll.u32 %s2538_s1, 4  ;;  %s1205_s12 = int_to_ptr.hbm [resolvable:$true] %s2690_s12  ;;  %s2704_s15 = int_to_ptr.vmem [resolvable:$true] %s1183_s15 }
  0x3e   : > { %564 = vmatpush.bf16.msra.mxu0 %v1541_v3  ;;  %1848 = vmatpush.bf16.msra.mxu3 %v1541_v3  ;;  %v2454_v11 = vld [vmem:[#allocation8 + $0x20] sm:$0xff]  ;;  %v2457_v14 = vld [vmem:[#allocation8 + $0x18] sm:$0xff]  ;;  %v1545_v16 = vld [vmem:[#allocation7 + $0x10] sm:$0xff]  ;;  %s2695_s14 = sshll.u32 %s1182_s30, 4  ;;  %s1220_s21 = scalar_lea.hbm %s2808_s9, %s1559_s23  ;;  %s1186_s14 = int_to_ptr.hbm [resolvable:$true] %s2695_s14 }
  0x3f   : > { %785 = vmatpush.bf16.msra.mxu1 %v1549_v4  ;;  %v2460_v17 = vld [vmem:[#allocation8 + $0x10] sm:$0xff]  ;;  %v1536_v18 = vld [vmem:[#allocation5 + $0x8] sm:$0xff]  ;;  %v1535_v21 = vld [vmem:[#allocation5] sm:$0xff]  ;;  %s2708_s27 = sshll.u32 %s1220_s21, 4  ;;  %s1221_s25 = sshll.u32 %s2550_s20, 4  ;;  %s1224_s27 = int_to_ptr.hbm [resolvable:$true] %s2708_s27  ;;  %s1222_s25 = int_to_ptr.vmem [resolvable:$true] %s1221_s25 }
  0x40   : > { %1006 = vmatpush.bf16.msra.mxu2 %v2448_v5  ;;  %v1544_v19 = vld [vmem:[#allocation7 + $0x8] sm:$0xff]  ;;  %v447_v22 = vld [vmem:[%s2431_s19] sm:$0xff]  ;;  %v449_v30 = vld [vmem:[%s2431_s19 + $0x10] sm:$0xff]  ;;  %s2713_s28 = scalar_lea.sflag [#allocation12], %s1163_s26  ;;  %s2117_s23 = sshra.s32 %s1205_s12, 4  ;;  %s2118_s23 = int_to_ptr.hbm [resolvable:$true] %s2117_s23 }
  0x41   : > { %v2463_v20 = vld [vmem:[#allocation8 + $0x8] sm:$0xff]  ;;  %v471_v24 = vld [vmem:[%s2431_s19 + $0xc0] sm:$0xff]  ;;  %v450_v31 = vld [vmem:[%s2431_s19 + $0x18] sm:$0xff]  ;;  %s2119_s3 = scalar_lea.hbm %s2118_s23, 128  ;;  %s2123_s5 = scalar_lea.hbm %s2807_s8, 256 }
  0x42   : > { %565 = vmatpush.bf16.msra.mxu0 %v1540_v6  ;;  %1849 = vmatpush.bf16.msra.mxu3 %v1540_v6  ;;  %v448_v23 = vld [vmem:[%s2431_s19 + $0x8] sm:$0xff]  ;;  %v1543_v26 = vld [vmem:[#allocation7] sm:$0xff]  ;;  %v473_v32 = vld [vmem:[%s2431_s19 + $0xd0] sm:$0xff]  ;;  %v480_v34 = vpack.c.bf16 %v450_v31, %v449_v30  ;;  %p2120_p1 = scmp.ne.s32.totalorder %s2118_s23, %s2119_s3  ;;  %p2124_p10 = scmp.lt.s32.totalorder %s2118_s23, %s2807_s8 }
  0x43   : > { %786 = vmatpush.bf16.msra.mxu1 %v1548_v7  ;;  %v472_v25 = vld [vmem:[%s2431_s19 + $0xc8] sm:$0xff]  ;;  %v1551_v27 = vld [vmem:[#allocation8] sm:$0xff]  ;;  %v479_v28 = vpack.c.bf16 %v448_v23, %v447_v22  ;;  %v474_v33 = vld [vmem:[%s2431_s19 + $0xd8] sm:$0xff]  ;;  %p2125_p12 = scmp.lt.s32.totalorder %s2123_s5, %s2119_s3 }
  0x44   : > { %1007 = vmatpush.bf16.msra.mxu2 %v2451_v8  ;;  %v2470_v29 = vpack.c.bf16 %v472_v25, %v471_v24  ;;  %v2477_v35 = vpack.c.bf16 %v474_v33, %v473_v32  ;;  %v451_v36 = vld [vmem:[%s2431_s19 + $0x20] sm:$0xff]  ;;  %v452_v37 = vld [vmem:[%s2431_s19 + $0x28] sm:$0xff]  ;;  %v453_v42 = vld [vmem:[%s2431_s19 + $0x30] sm:$0xff]  ;;  %p2121_p4 = pnand %p2120_p1, %p2407_p5 }
  0x45   : > { %v475_v38 = vld [vmem:[%s2431_s19 + $0xe0] sm:$0xff]  ;;  %v476_v39 = vld [vmem:[%s2431_s19 + $0xe8] sm:$0xff]  ;;  %v481_v40 = vpack.c.bf16 %v452_v37, %v451_v36  ;;  %v454_v43 = vld [vmem:[%s2431_s19 + $0x38] sm:$0xff]  ;;  %p2126_p13 = por %p2125_p12, %p2124_p10 }
  0x46   : > { %566 = vmatpush.bf16.msra.mxu0 %v1539_v9  ;;  %1850 = vmatpush.bf16.msra.mxu3 %v1539_v9  ;;  %v2484_v41 = vpack.c.bf16 %v476_v39, %v475_v38  ;;  %v477_v44 = vld [vmem:[%s2431_s19 + $0xf0] sm:$0xff]  ;;  %v478_v45 = vld [vmem:[%s2431_s19 + $0xf8] sm:$0xff]  ;;  %v482_v46 = vpack.c.bf16 %v454_v43, %v453_v42  ;;  %v455_v48 = vld [vmem:[%s2431_s19 + $0x40] sm:$0xff]  ;;  %p2122_p8 = pneg %p2121_p4 }
  0x47   : > { %787 = vmatpush.bf16.msra.mxu1 %v1547_v10  ;;  %v2495_v47 = vpack.c.bf16 %v478_v45, %v477_v44  ;;  %v456_v49 = vld [vmem:[%s2431_s19 + $0x48] sm:$0xff]  ;;  %v457_v51 = vld [vmem:[%s2431_s19 + $0x50] sm:$0xff]  ;;  %v458_v52 = vld [vmem:[%s2431_s19 + $0x58] sm:$0xff] }
  0x48   : > { %1008 = vmatpush.bf16.msra.mxu2 %v2454_v11  ;;  %v483_v50 = vpack.c.bf16 %v456_v49, %v455_v48  ;;  %v484_v53 = vpack.c.bf16 %v458_v52, %v457_v51  ;;  %v459_v54 = vld [vmem:[%s2431_s19 + $0x60] sm:$0xff]  ;;  %v460_v55 = vld [vmem:[%s2431_s19 + $0x68] sm:$0xff]  ;;  %v461_v57 = vld [vmem:[%s2431_s19 + $0x70] sm:$0xff]  ;;  %p2127_p0 = pnand %p2126_p13, %p2122_p8 }
  0x49   : > { %v485_v56 = vpack.c.bf16 %v460_v55, %v459_v54  ;;  %v462_v58 = vld [vmem:[%s2431_s19 + $0x78] sm:$0xff]  ;;  %v463_v60 = vld [vmem:[%s2431_s19 + $0x80] sm:$0xff]  ;;  %v464_v61 = vld [vmem:[%s2431_s19 + $0x88] sm:$0xff] }
  0x4a   : > { %567 = vmatpush.bf16.msra.mxu0 %v1538_v12  ;;  %1851 = vmatpush.bf16.msra.mxu3 %v1538_v12  ;;  %v486_v59 = vpack.c.bf16 %v462_v58, %v461_v57  ;;  %v487_v62 = vpack.c.bf16 %v464_v61, %v463_v60  ;;  %v2534_v12 = vld [vmem:[%s2805_s6] ss:$0 sm:$0xff]  ;;  %v468_v38 = vld [vmem:[%s2431_s19 + $0xa8] sm:$0xff] }
  0x4b   : > { %788 = vmatpush.bf16.msra.mxu1 %v1546_v13  ;;  %v467_v37 = vld [vmem:[%s2431_s19 + $0xa0] sm:$0xff] }
  0x4c   : > { %1009 = vmatpush.bf16.msra.mxu2 %v2457_v14  ;;  %v489_v44 = vpack.c.bf16 %v468_v38, %v467_v37 }
  0x4e   : > { %568 = vmatpush.bf16.msra.mxu0 %v1537_v15  ;;  %1852 = vmatpush.bf16.msra.mxu3 %v1537_v15  ;;  %v466_v15 = vld [vmem:[%s2431_s19 + $0x98] sm:$0xff] }
  0x4f   : > { %789 = vmatpush.bf16.msra.mxu1 %v1545_v16 }
  0x50   : > { %1010 = vmatpush.bf16.msra.mxu2 %v2460_v17 }
  0x52   : > { %569 = vmatpush.bf16.msra.mxu0 %v1536_v18  ;;  %1853 = vmatpush.bf16.msra.mxu3 %v1536_v18 }
  0x53   : > { %790 = vmatpush.bf16.msra.mxu1 %v1544_v19 }
  0x54   : > { %1011 = vmatpush.bf16.msra.mxu2 %v2463_v20 }
  0x56   : > { %570 = vmatpush.bf16.msra.mxu0 %v1535_v21  ;;  %1854 = vmatpush.bf16.msra.mxu3 %v1535_v21 }
  0x57   : > { %791 = vmatpush.bf16.msra.mxu1 %v1543_v26 }
  0x58   : > { %1012 = vmatpush.bf16.msra.mxu2 %v1551_v27 }
  0x59   : > { %571 = vmatmul.bf16.vlgmr.msra.gmra.mxu0 %v479_v28  ;;  %631 = vmatmul.bf16.vlgmr.msra.gmra.mxu3 %v2470_v29 }
  0x5a   : > { %1855 = vmatpush.bf16.msrb.mxu3 %v1550_v1  ;;  %792 = vmatmul.bf16.vlgmr.msra.gmra.mxu1 %v479_v28  ;;  %v2519_v1 = vld [vmem:[%s2801_s2] ss:$0 sm:$0xff] }
  0x5b   : > { %1013 = vmatmul.bf16.vlgmr.msra.gmra.mxu2 %v479_v28 }
  0x5e   : > { %1856 = vmatpush.bf16.msrb.mxu3 %v1549_v4 }
  0x62   : > { %1857 = vmatpush.bf16.msrb.mxu3 %v1548_v7 }
  0x66   : > { %1858 = vmatpush.bf16.msrb.mxu3 %v1547_v10 }
  0x69   : > { %576 = vmatmul.bf16.gmra.mxu0 %v480_v34  ;;  %636 = vmatmul.bf16.gmra.mxu3 %v2477_v35 }
  0x6a   : > { %1859 = vmatpush.bf16.msrb.mxu3 %v1546_v13  ;;  %797 = vmatmul.bf16.gmra.mxu1 %v480_v34 }
  0x6b   : > { %1018 = vmatmul.bf16.gmra.mxu2 %v480_v34 }
  0x6e   : > { %1860 = vmatpush.bf16.msrb.mxu3 %v1545_v16 }
  0x72   : > { %1861 = vmatpush.bf16.msrb.mxu3 %v1544_v19 }
  0x76   : > { %1862 = vmatpush.bf16.msrb.mxu3 %v1543_v26 }
  0x79   : > { %581 = vmatmul.bf16.gmra.mxu0 %v481_v40  ;;  %641 = vmatmul.bf16.gmra.mxu3 %v2484_v41 }
  0x7a   : > { %1863 = vmatpush.bf16.msra.mxu3 %v2445_v2  ;;  %802 = vmatmul.bf16.gmra.mxu1 %v481_v40  ;;  %v2524_v2 = vld [vmem:[%s2803_s4] ss:$0 sm:$0xff] }
  0x7b   : > { %1023 = vmatmul.bf16.gmra.mxu2 %v481_v40 }
  0x7e   : > { %1864 = vmatpush.bf16.msra.mxu3 %v2448_v5 }
  0x82   : > { %1865 = vmatpush.bf16.msra.mxu3 %v2451_v8 }
  0x86   : > { %1866 = vmatpush.bf16.msra.mxu3 %v2454_v11 }
  0x89   : > { %586 = vmatmul.bf16.gmra.mxu0 %v482_v46  ;;  %646 = vmatmul.bf16.gmra.mxu3 %v2495_v47 }
  0x8a   : > { %1867 = vmatpush.bf16.msra.mxu3 %v2457_v14  ;;  %807 = vmatmul.bf16.gmra.mxu1 %v482_v46  ;;  %v465_v14 = vld [vmem:[%s2431_s19 + $0x90] sm:$0xff] }
  0x8b   : > { %1028 = vmatmul.bf16.gmra.mxu2 %v482_v46 }
  0x8e   : > { %1868 = vmatpush.bf16.msra.mxu3 %v2460_v17 }
  0x92   : > { %1869 = vmatpush.bf16.msra.mxu3 %v2463_v20  ;;  %v488_v20 = vpack.c.bf16 %v466_v15, %v465_v14 }
  0x96   : > { %1870 = vmatpush.bf16.msra.mxu3 %v1551_v27 }
  0x99   : > { %591 = vmatmul.bf16.gmra.mxu0 %v483_v50  ;;  %852 = vmatmul.bf16.vlgmr.msrb.gmra.mxu3 %v2470_v29 }
  0x9a   : > { %812 = vmatmul.bf16.gmra.mxu1 %v483_v50 }
  0x9b   : > { %1033 = vmatmul.bf16.gmra.mxu2 %v483_v50 }
  0xa9   : > { %596 = vmatmul.bf16.gmra.mxu0 %v484_v53  ;;  %857 = vmatmul.bf16.gmra.mxu3 %v2477_v35 }
  0xaa   : > { %817 = vmatmul.bf16.gmra.mxu1 %v484_v53 }
  0xab   : > { %1038 = vmatmul.bf16.gmra.mxu2 %v484_v53 }
  0xb9   : > { %601 = vmatmul.bf16.gmra.mxu0 %v485_v56  ;;  %862 = vmatmul.bf16.gmra.mxu3 %v2484_v41 }
  0xba   : > { %822 = vmatmul.bf16.gmra.mxu1 %v485_v56 }
  0xbb   : > { %1043 = vmatmul.bf16.gmra.mxu2 %v485_v56 }
  0xc9   : > { %606 = vmatmul.bf16.gmra.mxu0 %v486_v59  ;;  %867 = vmatmul.bf16.gmra.mxu3 %v2495_v47 }
  0xca   : > { %827 = vmatmul.bf16.gmra.mxu1 %v486_v59 }
  0xcb   : > { %1048 = vmatmul.bf16.gmra.mxu2 %v486_v59 }
  0xd6   : > { %v572_v63 = vpop.f32.mrf.mxu0 }
  0xd7   : > { %v793_v0 = vpop.f32.mrf.mxu1  ;;  %v573_v6 = vadd.f32 %v2519_v1, %v572_v63 }
  0xd8   : > { %v794_v9 = vadd.f32 %v2524_v2, %v793_v0 }
  0xd9   : > { %611 = vmatmul.bf16.gmra.mxu0 %v487_v62  ;;  %1073 = vmatmul.bf16.vlgmr.msra.gmra.mxu3 %v2470_v29 }
  0xda   : > { %832 = vmatmul.bf16.gmra.mxu1 %v487_v62 }
  0xdb   : > { %1053 = vmatmul.bf16.gmra.mxu2 %v487_v62  ;;  %v470_v62 = vld [vmem:[%s2431_s19 + $0xb8] sm:$0xff] }
  0xdc   : > { %v632_v3 = vpop.f32.mrf.mxu3 }
  0xdd   : > { %v633_v17 = vadd.f32 %v2519_v1, %v632_v3 }
  0xde   : > { %v1014_v4 = vpop.f32.mrf.mxu2  ;;  %v574_v5 = vpop.f32.mrf.mxu0 }
  0xdf   : > { %v575_v7 = vadd.f32 %v2519_v1, %v574_v5  ;;  %v795_v8 = vpop.f32.mrf.mxu1  ;;  %v1015_v21 = vadd.f32 %v2534_v12, %v1014_v4 }
  0xe0   : > { %v796_v10 = vadd.f32 %v2524_v2, %v795_v8 }
  0xe1   : > { %v1565_v11 = vpack.c.bf16 %v575_v7, %v573_v6 }
  0xe2   : > { %v1645_v13 = vpack.c.bf16 %v796_v10, %v794_v9 }
  0xe3   : > { %1566 = vst [vmem:[%s2538_s1] sm:$0xff] %v1565_v11  }
  0xe4   : > { %1646 = vst [vmem:[%s2541_s18] sm:$0xff] %v1645_v13   ;;  %v634_v16 = vpop.f32.mrf.mxu3 }
  0xe5   : > { %v635_v18 = vadd.f32 %v2519_v1, %v634_v16 }
  0xe6   : > { %v1016_v19 = vpop.f32.mrf.mxu2  ;;  %v577_v23 = vpop.f32.mrf.mxu0 }
  0xe7   : > { %v1017_v22 = vadd.f32 %v2534_v12, %v1016_v19  ;;  %v1625_v24 = vpack.c.bf16 %v635_v18, %v633_v17  ;;  %v798_v25 = vpop.f32.mrf.mxu1  ;;  %v578_v30 = vadd.f32 %v2519_v1, %v577_v23 }
  0xe8   : > { %v799_v33 = vadd.f32 %v2524_v2, %v798_v25 }
  0xe9   : > { %v1725_v26 = vpack.c.bf16 %v1017_v22, %v1015_v21  ;;  %1813 = vst [vmem:[%s2538_s1 + $0x60] sm:$0xff] %v1625_v24   ;;  %616 = vmatmul.bf16.gmra.mxu0 %v488_v20  ;;  %1078 = vmatmul.bf16.gmra.mxu3 %v2477_v35 }
  0xea   : > { %837 = vmatmul.bf16.gmra.mxu1 %v488_v20 }
  0xeb   : > { %1726 = vst [vmem:[%s2550_s20] sm:$0xff] %v1725_v26   ;;  %1058 = vmatmul.bf16.gmra.mxu2 %v488_v20 }
  0xec   : > { %v637_v27 = vpop.f32.mrf.mxu3 }
  0xed   : > { %v638_v40 = vadd.f32 %v2519_v1, %v637_v27 }
  0xee   : > { %v1019_v28 = vpop.f32.mrf.mxu2  ;;  %v579_v29 = vpop.f32.mrf.mxu0 }
  0xef   : > { %v580_v31 = vadd.f32 %v2519_v1, %v579_v29  ;;  %v800_v32 = vpop.f32.mrf.mxu1  ;;  %v1020_v45 = vadd.f32 %v2534_v12, %v1019_v28 }
  0xf0   : > { %v801_v34 = vadd.f32 %v2524_v2, %v800_v32 }
  0xf1   : > { %v1570_v35 = vpack.c.bf16 %v580_v31, %v578_v30 }
  0xf2   : > { %v1650_v36 = vpack.c.bf16 %v801_v34, %v799_v33 }
  0xf3   : > { %1802 = vst [vmem:[%s2538_s1 + $0x8] sm:$0xff] %v1570_v35  }
  0xf4   : > { %1817 = vst [vmem:[%s2541_s18 + $0x8] sm:$0xff] %v1650_v36   ;;  %v639_v39 = vpop.f32.mrf.mxu3 }
  0xf5   : > { %v640_v42 = vadd.f32 %v2519_v1, %v639_v39 }
  0xf6   : > { %v1021_v43 = vpop.f32.mrf.mxu2  ;;  %v582_v48 = vpop.f32.mrf.mxu0 }
  0xf7   : > { %v1022_v46 = vadd.f32 %v2534_v12, %v1021_v43  ;;  %v1630_v49 = vpack.c.bf16 %v640_v42, %v638_v40  ;;  %v803_v50 = vpop.f32.mrf.mxu1  ;;  %v583_v55 = vadd.f32 %v2519_v1, %v582_v48 }
  0xf8   : > { %v804_v58 = vadd.f32 %v2524_v2, %v803_v50 }
  0xf9   : > { %v1730_v51 = vpack.c.bf16 %v1022_v46, %v1020_v45  ;;  %1814 = vst [vmem:[%s2538_s1 + $0x68] sm:$0xff] %v1630_v49   ;;  %621 = vmatmul.bf16.gmra.mxu0 %v489_v44  ;;  %1083 = vmatmul.bf16.gmra.mxu3 %v2484_v41  ;;  %v469_v41 = vld [vmem:[%s2431_s19 + $0xb0] sm:$0xff]  ;;  %s1202_s19 = sshll.u32 %s2541_s18, 4  ;;  %s2697_s19 = int_to_ptr.vmem [resolvable:$true] %s1202_s19 }
  0xfa   : > { %842 = vmatmul.bf16.gmra.mxu1 %v489_v44  ;;  %v490_v5 = vpack.c.bf16 %v470_v62, %v469_v41 }
  0xfb   : > { %1832 = vst [vmem:[%s2550_s20 + $0x8] sm:$0xff] %v1730_v51   ;;  %1063 = vmatmul.bf16.gmra.mxu2 %v489_v44 }
  0xfc   : > { %v642_v52 = vpop.f32.mrf.mxu3 }
  0xfd   : > { %v643_v0 = vadd.f32 %v2519_v1, %v642_v52 }
  0xfe   : > { %v1024_v53 = vpop.f32.mrf.mxu2  ;;  %v584_v54 = vpop.f32.mrf.mxu0 }
  0xff   : > { %v585_v56 = vadd.f32 %v2519_v1, %v584_v54  ;;  %v805_v57 = vpop.f32.mrf.mxu1  ;;  %v1025_v6 = vadd.f32 %v2534_v12, %v1024_v53 }
 0x100   : > { %v806_v59 = vadd.f32 %v2524_v2, %v805_v57 }
 0x101   : > { %v1575_v60 = vpack.c.bf16 %v585_v56, %v583_v55 }
 0x102   : > { %v1655_v61 = vpack.c.bf16 %v806_v59, %v804_v58 }
 0x103   : > { %1803 = vst [vmem:[%s2538_s1 + $0x10] sm:$0xff] %v1575_v60  }
 0x104   : > { %1818 = vst [vmem:[%s2541_s18 + $0x10] sm:$0xff] %v1655_v61   ;;  %v644_v63 = vpop.f32.mrf.mxu3 }
 0x105   : > { %v645_v3 = vadd.f32 %v2519_v1, %v644_v63 }
 0x106   : > { %v1026_v4 = vpop.f32.mrf.mxu2  ;;  %v587_v8 = vpop.f32.mrf.mxu0 }
 0x107   : > { %v1027_v7 = vadd.f32 %v2534_v12, %v1026_v4  ;;  %v1635_v9 = vpack.c.bf16 %v645_v3, %v643_v0  ;;  %v808_v10 = vpop.f32.mrf.mxu1  ;;  %v588_v16 = vadd.f32 %v2519_v1, %v587_v8 }
 0x108   : > { %v809_v19 = vadd.f32 %v2524_v2, %v808_v10 }
 0x109   : > { %v1735_v11 = vpack.c.bf16 %v1027_v7, %v1025_v6  ;;  %1815 = vst [vmem:[%s2538_s1 + $0x70] sm:$0xff] %v1635_v9   ;;  %626 = vmatmul.bf16.gmra.mxu0 %v490_v5  ;;  %1088 = vmatmul.bf16.gmra.mxu3 %v2495_v47 }
 0x10a   : > { %847 = vmatmul.bf16.gmra.mxu1 %v490_v5 }
 0x10b   : > { %1833 = vst [vmem:[%s2550_s20 + $0x10] sm:$0xff] %v1735_v11   ;;  %1068 = vmatmul.bf16.gmra.mxu2 %v490_v5 }
 0x10c   : > { %v647_v13 = vpop.f32.mrf.mxu3 }
 0x10d   : > { %v648_v23 = vadd.f32 %v2519_v1, %v647_v13 }
 0x10e   : > { %v1029_v14 = vpop.f32.mrf.mxu2  ;;  %v589_v15 = vpop.f32.mrf.mxu0 }
 0x10f   : > { %v590_v17 = vadd.f32 %v2519_v1, %v589_v15  ;;  %v810_v18 = vpop.f32.mrf.mxu1  ;;  %v1030_v26 = vadd.f32 %v2534_v12, %v1029_v14 }
 0x110   : > { %v811_v20 = vadd.f32 %v2524_v2, %v810_v18 }
 0x111   : > { %v1580_v21 = vpack.c.bf16 %v590_v17, %v588_v16 }
 0x112   : > { %v1660_v22 = vpack.c.bf16 %v811_v20, %v809_v19 }
 0x113   : > { %1804 = vst [vmem:[%s2538_s1 + $0x18] sm:$0xff] %v1580_v21  }
 0x114   : > { %1819 = vst [vmem:[%s2541_s18 + $0x18] sm:$0xff] %v1660_v22   ;;  %v649_v47 = vpop.f32.mrf.mxu3 }
 0x115   : > { %v650_v24 = vadd.f32 %v2519_v1, %v649_v47 }
 0x116   : > { %v1031_v25 = vpop.f32.mrf.mxu2  ;;  %v592_v28 = vpop.f32.mrf.mxu0 }
 0x117   : > { %v1032_v27 = vadd.f32 %v2534_v12, %v1031_v25  ;;  %v1640_v29 = vpack.c.bf16 %v650_v24, %v648_v23  ;;  %v813_v30 = vpop.f32.mrf.mxu1  ;;  %v593_v35 = vadd.f32 %v2519_v1, %v592_v28 }
 0x118   : > { %v814_v38 = vadd.f32 %v2524_v2, %v813_v30 }
 0x119   : > { %v1740_v31 = vpack.c.bf16 %v1032_v27, %v1030_v26  ;;  %1816 = vst [vmem:[%s2538_s1 + $0x78] sm:$0xff] %v1640_v29  }
 0x11b   : > { %1834 = vst [vmem:[%s2550_s20 + $0x18] sm:$0xff] %v1740_v31  }
 0x11c   : > { %v853_v32 = vpop.f32.mrf.mxu3 }
 0x11d   : > { %v854_v44 = vadd.f32 %v2524_v2, %v853_v32 }
 0x11e   : > { %v1034_v33 = vpop.f32.mrf.mxu2  ;;  %v594_v34 = vpop.f32.mrf.mxu0 }
 0x11f   : > { %v595_v36 = vadd.f32 %v2519_v1, %v594_v34  ;;  %v815_v37 = vpop.f32.mrf.mxu1  ;;  %v1035_v48 = vadd.f32 %v2534_v12, %v1034_v33 }
 0x120   : > { %v816_v39 = vadd.f32 %v2524_v2, %v815_v37 }
 0x121   : > { %v1585_v40 = vpack.c.bf16 %v595_v36, %v593_v35 }
 0x122   : > { %v1665_v42 = vpack.c.bf16 %v816_v39, %v814_v38 }
 0x123   : > { %1805 = vst [vmem:[%s2538_s1 + $0x20] sm:$0xff] %v1585_v40  }
 0x124   : > { %1820 = vst [vmem:[%s2541_s18 + $0x20] sm:$0xff] %v1665_v42   ;;  %v855_v43 = vpop.f32.mrf.mxu3 }
 0x125   : > { %v856_v45 = vadd.f32 %v2524_v2, %v855_v43 }
 0x126   : > { %v1036_v46 = vpop.f32.mrf.mxu2  ;;  %v597_v50 = vpop.f32.mrf.mxu0 }
 0x127   : > { %v1037_v49 = vadd.f32 %v2534_v12, %v1036_v46  ;;  %v1705_v51 = vpack.c.bf16 %v856_v45, %v854_v44  ;;  %v818_v52 = vpop.f32.mrf.mxu1  ;;  %v598_v57 = vadd.f32 %v2519_v1, %v597_v50 }
 0x128   : > { %v819_v60 = vadd.f32 %v2524_v2, %v818_v52 }
 0x129   : > { %v1745_v53 = vpack.c.bf16 %v1037_v49, %v1035_v48  ;;  %1828 = vst [vmem:[%s2541_s18 + $0x60] sm:$0xff] %v1705_v51  }
 0x12b   : > { %1835 = vst [vmem:[%s2550_s20 + $0x20] sm:$0xff] %v1745_v53  }
 0x12c   : > { %v858_v54 = vpop.f32.mrf.mxu3 }
 0x12d   : > { %v859_v0 = vadd.f32 %v2524_v2, %v858_v54 }
 0x12e   : > { %v1039_v55 = vpop.f32.mrf.mxu2  ;;  %v599_v56 = vpop.f32.mrf.mxu0 }
 0x12f   : > { %v600_v58 = vadd.f32 %v2519_v1, %v599_v56  ;;  %v820_v59 = vpop.f32.mrf.mxu1  ;;  %v1040_v5 = vadd.f32 %v2534_v12, %v1039_v55 }
 0x130   : > { %v821_v61 = vadd.f32 %v2524_v2, %v820_v59 }
 0x131   : > { %v1590_v41 = vpack.c.bf16 %v600_v58, %v598_v57 }
 0x132   : > { %v1670_v62 = vpack.c.bf16 %v821_v61, %v819_v60 }
 0x133   : > { %1806 = vst [vmem:[%s2538_s1 + $0x28] sm:$0xff] %v1590_v41  }
 0x134   : > { %1821 = vst [vmem:[%s2541_s18 + $0x28] sm:$0xff] %v1670_v62   ;;  %v860_v63 = vpop.f32.mrf.mxu3 }
 0x135   : > { %v861_v3 = vadd.f32 %v2524_v2, %v860_v63 }
 0x136   : > { %v1041_v4 = vpop.f32.mrf.mxu2  ;;  %v602_v7 = vpop.f32.mrf.mxu0 }
 0x137   : > { %v1042_v6 = vadd.f32 %v2534_v12, %v1041_v4  ;;  %v1710_v8 = vpack.c.bf16 %v861_v3, %v859_v0  ;;  %v823_v9 = vpop.f32.mrf.mxu1  ;;  %v603_v15 = vadd.f32 %v2519_v1, %v602_v7 }
 0x138   : > { %v824_v18 = vadd.f32 %v2524_v2, %v823_v9 }
 0x139   : > { %v1750_v10 = vpack.c.bf16 %v1042_v6, %v1040_v5  ;;  %1829 = vst [vmem:[%s2541_s18 + $0x68] sm:$0xff] %v1710_v8  }
 0x13b   : > { %1836 = vst [vmem:[%s2550_s20 + $0x28] sm:$0xff] %v1750_v10  }
 0x13c   : > { %v863_v11 = vpop.f32.mrf.mxu3 }
 0x13d   : > { %v864_v47 = vadd.f32 %v2524_v2, %v863_v11 }
 0x13e   : > { %v1044_v13 = vpop.f32.mrf.mxu2  ;;  %v604_v14 = vpop.f32.mrf.mxu0 }
 0x13f   : > { %v605_v16 = vadd.f32 %v2519_v1, %v604_v14  ;;  %v825_v17 = vpop.f32.mrf.mxu1  ;;  %v1045_v25 = vadd.f32 %v2534_v12, %v1044_v13 }
 0x140   : > { %v826_v19 = vadd.f32 %v2524_v2, %v825_v17 }
 0x141   : > { %v1595_v20 = vpack.c.bf16 %v605_v16, %v603_v15 }
 0x142   : > { %v1675_v21 = vpack.c.bf16 %v826_v19, %v824_v18 }
 0x143   : > { %1807 = vst [vmem:[%s2538_s1 + $0x30] sm:$0xff] %v1595_v20  }
 0x144   : > { %1822 = vst [vmem:[%s2541_s18 + $0x30] sm:$0xff] %v1675_v21   ;;  %v865_v22 = vpop.f32.mrf.mxu3 }
 0x145   : > { %v866_v23 = vadd.f32 %v2524_v2, %v865_v22 }
 0x146   : > { %v1046_v24 = vpop.f32.mrf.mxu2  ;;  %v607_v27 = vpop.f32.mrf.mxu0 }
 0x147   : > { %v1047_v26 = vadd.f32 %v2534_v12, %v1046_v24  ;;  %v1715_v28 = vpack.c.bf16 %v866_v23, %v864_v47  ;;  %v828_v29 = vpop.f32.mrf.mxu1  ;;  %v608_v34 = vadd.f32 %v2519_v1, %v607_v27 }
 0x148   : > { %v829_v37 = vadd.f32 %v2524_v2, %v828_v29 }
 0x149   : > { %v1755_v30 = vpack.c.bf16 %v1047_v26, %v1045_v25  ;;  %1830 = vst [vmem:[%s2541_s18 + $0x70] sm:$0xff] %v1715_v28  }
 0x14b   : > { %1837 = vst [vmem:[%s2550_s20 + $0x30] sm:$0xff] %v1755_v30  }
 0x14c   : > { %v868_v31 = vpop.f32.mrf.mxu3 }
 0x14d   : > { %v869_v43 = vadd.f32 %v2524_v2, %v868_v31 }
 0x14e   : > { %v1049_v32 = vpop.f32.mrf.mxu2  ;;  %v609_v33 = vpop.f32.mrf.mxu0 }
 0x14f   : > { %v610_v35 = vadd.f32 %v2519_v1, %v609_v33  ;;  %v830_v36 = vpop.f32.mrf.mxu1  ;;  %v1050_v46 = vadd.f32 %v2534_v12, %v1049_v32 }
 0x150   : > { %v831_v38 = vadd.f32 %v2524_v2, %v830_v36 }
 0x151   : > { %v1600_v39 = vpack.c.bf16 %v610_v35, %v608_v34 }
 0x152   : > { %v1680_v40 = vpack.c.bf16 %v831_v38, %v829_v37 }
 0x153   : > { %1808 = vst [vmem:[%s2538_s1 + $0x38] sm:$0xff] %v1600_v39  }
 0x154   : > { %1823 = vst [vmem:[%s2541_s18 + $0x38] sm:$0xff] %v1680_v40   ;;  %v870_v42 = vpop.f32.mrf.mxu3 }
 0x155   : > { %v871_v44 = vadd.f32 %v2524_v2, %v870_v42 }
 0x156   : > { %v1051_v45 = vpop.f32.mrf.mxu2  ;;  %v612_v49 = vpop.f32.mrf.mxu0 }
 0x157   : > { %v1052_v48 = vadd.f32 %v2534_v12, %v1051_v45  ;;  %v1720_v50 = vpack.c.bf16 %v871_v44, %v869_v43  ;;  %v833_v51 = vpop.f32.mrf.mxu1  ;;  %v613_v56 = vadd.f32 %v2519_v1, %v612_v49 }
 0x158   : > { %v834_v59 = vadd.f32 %v2524_v2, %v833_v51 }
 0x159   : > { %v1760_v52 = vpack.c.bf16 %v1052_v48, %v1050_v46  ;;  %1831 = vst [vmem:[%s2541_s18 + $0x78] sm:$0xff] %v1720_v50  }
 0x15b   : > { %1838 = vst [vmem:[%s2550_s20 + $0x38] sm:$0xff] %v1760_v52  }
 0x15c   : > { %v1074_v53 = vpop.f32.mrf.mxu3 }
 0x15d   : > { %v1075_v63 = vadd.f32 %v2534_v12, %v1074_v53 }
 0x15e   : > { %v1054_v54 = vpop.f32.mrf.mxu2  ;;  %v614_v55 = vpop.f32.mrf.mxu0 }
 0x15f   : > { %v615_v57 = vadd.f32 %v2519_v1, %v614_v55  ;;  %v835_v58 = vpop.f32.mrf.mxu1  ;;  %v1055_v4 = vadd.f32 %v2534_v12, %v1054_v54 }
 0x160   : > { %v836_v60 = vadd.f32 %v2524_v2, %v835_v58 }
 0x161   : > { %v1605_v61 = vpack.c.bf16 %v615_v57, %v613_v56 }
 0x162   : > { %v1685_v41 = vpack.c.bf16 %v836_v60, %v834_v59 }
 0x163   : > { %1809 = vst [vmem:[%s2538_s1 + $0x40] sm:$0xff] %v1605_v61  }
 0x164   : > { %1824 = vst [vmem:[%s2541_s18 + $0x40] sm:$0xff] %v1685_v41   ;;  %v1076_v62 = vpop.f32.mrf.mxu3 }
 0x165   : > { %v1077_v3 = vadd.f32 %v2534_v12, %v1076_v62 }
 0x166   : > { %v1056_v0 = vpop.f32.mrf.mxu2  ;;  %v617_v6 = vpop.f32.mrf.mxu0 }
 0x167   : > { %v1057_v5 = vadd.f32 %v2534_v12, %v1056_v0  ;;  %v1785_v7 = vpack.c.bf16 %v1077_v3, %v1075_v63  ;;  %v838_v8 = vpop.f32.mrf.mxu1  ;;  %v618_v14 = vadd.f32 %v2519_v1, %v617_v6 }
 0x168   : > { %v839_v17 = vadd.f32 %v2524_v2, %v838_v8 }
 0x169   : > { %v1765_v9 = vpack.c.bf16 %v1057_v5, %v1055_v4  ;;  %1843 = vst [vmem:[%s2550_s20 + $0x60] sm:$0xff] %v1785_v7  }
 0x16b   : > { %1839 = vst [vmem:[%s2550_s20 + $0x40] sm:$0xff] %v1765_v9  }
 0x16c   : > { %v1079_v10 = vpop.f32.mrf.mxu3 }
 0x16d   : > { %v1080_v22 = vadd.f32 %v2534_v12, %v1079_v10 }
 0x16e   : > { %v1059_v11 = vpop.f32.mrf.mxu2  ;;  %v619_v13 = vpop.f32.mrf.mxu0 }
 0x16f   : > { %v620_v15 = vadd.f32 %v2519_v1, %v619_v13  ;;  %v840_v16 = vpop.f32.mrf.mxu1  ;;  %v1060_v24 = vadd.f32 %v2534_v12, %v1059_v11 }
 0x170   : > { %v841_v18 = vadd.f32 %v2524_v2, %v840_v16 }
 0x171   : > { %v1610_v19 = vpack.c.bf16 %v620_v15, %v618_v14 }
 0x172   : > { %v1690_v20 = vpack.c.bf16 %v841_v18, %v839_v17 }
 0x173   : > { %1810 = vst [vmem:[%s2538_s1 + $0x48] sm:$0xff] %v1610_v19  }
 0x174   : > { %1825 = vst [vmem:[%s2541_s18 + $0x48] sm:$0xff] %v1690_v20   ;;  %v1081_v21 = vpop.f32.mrf.mxu3 }
 0x175   : > { %v1082_v23 = vadd.f32 %v2534_v12, %v1081_v21 }
 0x176   : > { %v1061_v47 = vpop.f32.mrf.mxu2  ;;  %v622_v26 = vpop.f32.mrf.mxu0 }
 0x177   : > { %v1062_v25 = vadd.f32 %v2534_v12, %v1061_v47  ;;  %v1790_v27 = vpack.c.bf16 %v1082_v23, %v1080_v22  ;;  %v843_v28 = vpop.f32.mrf.mxu1  ;;  %v623_v33 = vadd.f32 %v2519_v1, %v622_v26 }
 0x178   : > { %v844_v36 = vadd.f32 %v2524_v2, %v843_v28 }
 0x179   : > { %v1770_v29 = vpack.c.bf16 %v1062_v25, %v1060_v24  ;;  %1844 = vst [vmem:[%s2550_s20 + $0x68] sm:$0xff] %v1790_v27  }
 0x17b   : > { %1840 = vst [vmem:[%s2550_s20 + $0x48] sm:$0xff] %v1770_v29  }
 0x17c   : > { %v1084_v30 = vpop.f32.mrf.mxu3 }
 0x17d   : > { %v1085_v42 = vadd.f32 %v2534_v12, %v1084_v30 }
 0x17e   : > { %v1064_v31 = vpop.f32.mrf.mxu2  ;;  %v624_v32 = vpop.f32.mrf.mxu0 }
 0x17f   : > { %v625_v34 = vadd.f32 %v2519_v1, %v624_v32  ;;  %v845_v35 = vpop.f32.mrf.mxu1  ;;  %v1065_v45 = vadd.f32 %v2534_v12, %v1064_v31 }
 0x180   : > { %v846_v37 = vadd.f32 %v2524_v2, %v845_v35 }
 0x181   : > { %v1615_v38 = vpack.c.bf16 %v625_v34, %v623_v33 }
 0x182   : > { %v1695_v39 = vpack.c.bf16 %v846_v37, %v844_v36 }
 0x183   : > { %1811 = vst [vmem:[%s2538_s1 + $0x50] sm:$0xff] %v1615_v38  }
 0x184   : > { %1826 = vst [vmem:[%s2541_s18 + $0x50] sm:$0xff] %v1695_v39   ;;  %v1086_v40 = vpop.f32.mrf.mxu3 }
 0x185   : > { %v1087_v44 = vadd.f32 %v2534_v12, %v1086_v40 }
 0x186   : > { %v1066_v43 = vpop.f32.mrf.mxu2  ;;  %v627_v48 = vpop.f32.mrf.mxu0 }
 0x187   : > { %v1067_v46 = vadd.f32 %v2534_v12, %v1066_v43  ;;  %v1795_v49 = vpack.c.bf16 %v1087_v44, %v1085_v42  ;;  %v848_v50 = vpop.f32.mrf.mxu1  ;;  %v628_v55 = vadd.f32 %v2519_v1, %v627_v48 }
 0x188   : > { %v849_v58 = vadd.f32 %v2524_v2, %v848_v50 }
 0x189   : > { %v1775_v51 = vpack.c.bf16 %v1067_v46, %v1065_v45  ;;  %1845 = vst [vmem:[%s2550_s20 + $0x70] sm:$0xff] %v1795_v49  }
 0x18b   : > { %1841 = vst [vmem:[%s2550_s20 + $0x50] sm:$0xff] %v1775_v51  }
 0x18c   : > { %v1089_v52 = vpop.f32.mrf.mxu3 }
 0x18d   : > { %v1090_v61 = vadd.f32 %v2534_v12, %v1089_v52 }
 0x18e   : > { %v1069_v53 = vpop.f32.mrf.mxu2  ;;  %v629_v54 = vpop.f32.mrf.mxu0 }
 0x18f   : > { %v630_v56 = vadd.f32 %v2519_v1, %v629_v54  ;;  %v850_v57 = vpop.f32.mrf.mxu1 }
 0x190   : > { %v851_v59 = vadd.f32 %v2524_v2, %v850_v57 }
 0x191   : > { %v1620_v60 = vpack.c.bf16 %v630_v56, %v628_v55 }
 0x192   : > { %v1700_v1 = vpack.c.bf16 %v851_v59, %v849_v58 }
 0x193   : > { %1812 = vst [vmem:[%s2538_s1 + $0x58] sm:$0xff] %v1620_v60  }
 0x194   : > { %1827 = vst [vmem:[%s2541_s18 + $0x58] sm:$0xff] %v1700_v1   ;;  %v1091_v2 = vpop.f32.mrf.mxu3 }
 0x195   : > { %v1092_v62 = vadd.f32 %v2534_v12, %v1091_v2 }
 0x196   : > { %v1071_v41 = vpop.f32.mrf.mxu2 }
 0x197   : > { %2130 = shalt.err (!%p2127_p0)
}
 0x198   : > { %s2262_s26 = smov 64   ;;  %s2263_s22 = smov 4   ;;  %v1070_v63 = vadd.f32 %v2534_v12, %v1069_v53  ;;  %v1072_v0 = vadd.f32 %v2534_v12, %v1071_v41 }
 0x199   : > { %1886 = dma.vmem_to_hbm [thread:$0]  (%p2407_p5), %s2697_s19, 2048, %s1205_s12, %s2713_s28, %s2262_s26, %s2262_s26, %s2263_s22  }
 0x19a   : > { %s1159_s21 = scalar_lea.sflag [#allocation4], %s2427_s24  ;;  %s2145_s23 = sshra.s32 %s1186_s14, 4  ;;  %s2146_s23 = int_to_ptr.hbm [resolvable:$true] %s2145_s23 }
 0x19b   : > { %s2147_s3 = scalar_lea.hbm %s2146_s23, 128  ;;  %s2151_s5 = scalar_lea.hbm %s2806_s7, 256 }
 0x19c   : > { %p2148_p3 = scmp.ne.s32.totalorder %s2146_s23, %s2147_s3  ;;  %p2152_p2 = scmp.lt.s32.totalorder %s2146_s23, %s2806_s7 }
 0x19d   : > { %p2153_p1 = scmp.lt.s32.totalorder %s2151_s5, %s2147_s3 }
 0x19e   : > { %p2149_p7 = pnand %p2148_p3, %p2407_p5 }
 0x19f   : > { %p2154_p4 = por %p2153_p1, %p2152_p2 }
 0x1a0   : > { %p2150_p9 = pneg %p2149_p7 }
 0x1a2   : > { %p2155_p8 = pnand %p2154_p4, %p2150_p9 }
 0x1a4   : > { %2158 = shalt.err (!%p2155_p8)
}
 0x1a5   : > { %1885 = dma.vmem_to_hbm [thread:$0]  (%p2407_p5), %s2704_s15, 2048, %s1186_s14, %s1159_s21, %s2262_s26, %s2262_s26, %s2263_s22   ;;  %v1800_v12 = vpack.c.bf16 %v1092_v62, %v1090_v61  ;;  %v1780_v3 = vpack.c.bf16 %v1072_v0, %v1070_v63 }
 0x1a6   : > { %s2173_s24 = sshra.s32 %s1224_s27, 4  ;;  %s2179_s3 = scalar_lea.hbm %s2808_s9, 256  ;;  %s2174_s24 = int_to_ptr.hbm [resolvable:$true] %s2173_s24 }
 0x1a7   : > { %1846 = vst [vmem:[%s2550_s20 + $0x78] sm:$0xff] %v1800_v12   ;;  %s2175_s19 = scalar_lea.hbm %s2174_s24, 128  ;;  %p2180_p0 = scmp.lt.s32.totalorder %s2174_s24, %s2808_s9 }
 0x1a8   : > { %1842 = vst [vmem:[%s2550_s20 + $0x58] sm:$0xff] %v1780_v3   ;;  %p2176_p10 = scmp.ne.s32.totalorder %s2174_s24, %s2175_s19  ;;  %p2181_p3 = scmp.lt.s32.totalorder %s2179_s3, %s2175_s19 }
 0x1aa   : > { %p2177_p12 = pnand %p2176_p10, %p2407_p5  ;;  %p2182_p7 = por %p2181_p3, %p2180_p0 }
 0x1ac   : > { %p2178_p13 = pneg %p2177_p12 }
 0x1ae   : > { %p2183_p9 = pnand %p2182_p7, %p2178_p13 }
 0x1b0   : > { %2186 = shalt.err (!%p2183_p9)
}
 0x1b1   : > { %1887 = dma.vmem_to_hbm [thread:$0]  (%p2407_p5), %s1222_s25, 2048, %s1224_s27, %s2713_s28, %s2262_s26, %s2262_s26, %s2263_s22  }
 0x1b2 PF: > { %s2831_s20 = sld [smem:[#allocation19_spill]]  ;;  %p1906_p2 = pnand %p1415_p11, %p2361_p6 }
 0x1b3   : > { %s2833_s21 = sld [smem:[#allocation20_spill]] }
 0x1b4   : > { %p1907_p1 = pneg %p1906_p2 }
 0x1b8   : > { %s1238_s18 = sand.u32 1, %s2831_s20  }
 0x1b9   : > { %s1239_s5 = scalar_lea.sflag [#allocation4], %s1238_s18 }
 0x1ba   : > { %2224 = dma.done.wait (%p1907_p1), %s1239_s5, 2048  }
 0x1bb   : > { %2226 = vsyncadd (%p1907_p1), %s1239_s5, 4294965248  ;;  %s2834_s30 = sadd.s32 4294967294, %s2833_s21  }
 0x1bc   : > { %s1248_s16 = sand.u32 1, %s2834_s30  }
 0x1bd   : > { %s1249_s17 = scalar_lea.sflag [#allocation12], %s1248_s16 }
 0x1be   : > { %2228 = dma.done.wait (%p1907_p1), %s1249_s17, 4096  }
 0x1bf   : > { %2230 = vsyncadd (%p1907_p1), %s1249_s17, 4294963200  ;;  %s31_s14 = sadd.s32 1, %s2833_s21   ;;  %s2835_s27 = sld [smem:[#allocation22_spill]] }
 0x1c0   : > { %p28_p5 = scmp.ge.s32.totalorder %s31_s14, 4   ;;  %s2836_s30 = smov %s2237_s10 }
 0x1c1   : > { %s2837_s10 = smov %s2241_s11  ;;  %s2838_s11 = smov %s2416_s29 }
 0x1c2   : > { %s2839_s12 = smov %s2249_s13  ;;  %30 = sbr.rel (!%p28_p5) target bundleno = 14 (0xe), region = 137 }
 0x1c5   : > { %s2840_s13 = smov %s2835_s27 }
 0x1c7   :  { %1265 = vsyncpa [#allocation3], 1 }
 0x1c8   :  { %1267 = vsyncpa [#allocation3 + $0x1], 1 }
 0x1c9   :  { %1268 = vsyncpa [#allocation6], 1 }
 0x1ca   :  { %1269 = vsyncpa [#allocation9], 1 }
 0x1cb   :  { %1270 = vsyncpa [#allocation4], 1 }
 0x1cc   :  { %1272 = vsyncpa [#allocation4 + $0x1], 1 }
 0x1cd   :  { %1273 = vsyncpa [#allocation12], 1 }
 0x1ce   :  { %1275 = vsyncpa [#allocation12 + $0x1], 1 }

</bundles_post_ra>
